<compile_context>
chip_gen: v7x
topology: tpu7x:2x2x1
jax: 0.10.0
libtpu: 0.0.40
codegen_flags: <defaults>
</compile_context>

<pallas_src>
import jax
import jax.numpy as jnp
from jax.experimental import pallas as pl
from jax.experimental.pallas import tpu as pltpu

C_FIXED = 133          # hard-coded channel count in the PyTorch module
TS_MAX_DEFAULT = 8192  # S-tile upper bound (f32: ~16.6 MiB double-buffered)


def _flatten_permute_kernel(x_ref, o_ref):
    # x_ref block: (C, tS)  -> current (batch, S-tile) slab, batch squeezed
    # o_ref block: (tS, C)
    o_ref[...] = x_ref[...].T  # clean 2-D transpose -> XLU vxpose


def flatten_forward(x, *, ts_max=TS_MAX_DEFAULT):
    """x: (B, 133, H, W) -> (B, H*W, 133), matching
    x.view(B, 133, -1).permute(0, 2, 1) in PyTorch."""
    B, C, H, W = x.shape
    assert C == C_FIXED, f"Flatten expects {C_FIXED} channels, got {C}"
    S = H * W
    x3 = x.reshape(B, C, S)  # glue: pure reshape (view) in plain JAX

    if S <= ts_max:
        # Full-extent S block: satisfies the (8,128) rule via the
        # "equals full array dim" exception, regardless of S's value.
        tS = S
    else:
        # Tiled S: tile must be a multiple of 128 (last dim of the input
        # block and second-to-last dim of the output block).
        tS = max(128, (ts_max // 128) * 128)
    num_s_tiles = pl.cdiv(S, tS)

    itemsize = jnp.dtype(x.dtype).itemsize
    out = pl.pallas_call(
        _flatten_permute_kernel,
        out_shape=jax.ShapeDtypeStruct((B, S, C), x.dtype),
        grid_spec=pltpu.PrefetchScalarGridSpec(
            num_scalar_prefetch=0,
            grid=(B, num_s_tiles),
            in_specs=[
                # Batch dim squeezed (None); C kept at full 133 extent.
                pl.BlockSpec((None, C, tS), lambda b, s: (b, 0, s)),
            ],
            out_specs=pl.BlockSpec((None, tS, C), lambda b, s: (b, s, 0)),
        ),
        compiler_params=pltpu.CompilerParams(
            # Both axes independent -> shard across v7x's two TensorCores;
            # harmless on single-TC v5e/v6e.
            dimension_semantics=("parallel", "parallel"),
            # Explicit scoped-VMEM limit: safe on all generations (<= v7x's
            # 64 MiB physical), and lifts v5e's 16 MiB default for tS=8192.
            vmem_limit_bytes=32 * 1024 * 1024,
        ),
        # Pure bandwidth op: zero FLOPs, one read + one write of the tensor.
        cost_estimate=pl.CostEstimate(
            flops=0,
            transcendentals=0,
            bytes_accessed=2 * B * C * S * itemsize,
        ),
    )(x3)
    return out


if __name__ == "__main__":
    key = jax.random.PRNGKey(0)

    # Case 1: small spatial extent (single full-extent S tile).
    B, C, H, W = 2, C_FIXED, 4, 4
    x = jax.random.normal(key, (B, C, H, W), dtype=jnp.float32)
    y = jax.block_until_ready(flatten_forward(x))
    ref = jnp.transpose(x.reshape(B, C, H * W), (0, 2, 1))
    assert y.shape == (B, H * W, C), y.shape
    assert jnp.allclose(y, ref), "mismatch vs reference (case 1)"

    # Case 2: force the tiled-S path with a partial last tile
    # (S = 320, tS = 128 -> 3 S-tiles, last one masked).
    B2, H2, W2 = 2, 16, 20
    x2 = jax.random.normal(jax.random.PRNGKey(1), (B2, C_FIXED, H2, W2),
                           dtype=jnp.float32)
    y2 = jax.block_until_ready(flatten_forward(x2, ts_max=128))
    ref2 = jnp.transpose(x2.reshape(B2, C_FIXED, H2 * W2), (0, 2, 1))
    assert y2.shape == (B2, H2 * W2, C_FIXED), y2.shape
    assert jnp.allclose(y2, ref2), "mismatch vs reference (case 2)"

    print("KERNEL_OK")
</pallas_src>

<mosaic_0001>
module attributes {stable_mosaic.version = 11 : i64} {
  func.func @_flatten_permute_kernel(%arg0: i32, %arg1: i32, %arg2: memref<1x133x16xf32, #tpu.memory_space<vmem>>, %arg3: memref<1x16x133xf32, #tpu.memory_space<vmem>>) attributes {dimension_semantics = [#tpu.dimension_semantics<parallel>, #tpu.dimension_semantics<parallel>], iteration_bounds = array<i64: 2, 1>, scalar_prefetch = 0 : i64, scratch_operands = 0 : i64, tpu.core_type = #tpu.core_type<tc>, window_params = [{transform_indices = @transform_0, window_bounds = array<i64: 1, 133, 16>}, {transform_indices = @transform_1, window_bounds = array<i64: 1, 16, 133>}]} {
    %c0 = arith.constant 0 : index
    %c0_0 = arith.constant 0 : index
    %c0_1 = arith.constant 0 : index
    %0 = vector.load %arg2[%c0, %c0_0, %c0_1] : memref<1x133x16xf32, #tpu.memory_space<vmem>>, vector<1x133x16xf32>
    %1 = vector.shape_cast %0 : vector<1x133x16xf32> to vector<133x16xf32>
    %2 = tpu.transpose %1, [1, 0] : vector<133x16xf32> -> vector<16x133xf32>
    %c0_2 = arith.constant 0 : index
    %c0_3 = arith.constant 0 : index
    %c0_4 = arith.constant 0 : index
    %3 = vector.load %arg3[%c0_2, %c0_3, %c0_4] : memref<1x16x133xf32, #tpu.memory_space<vmem>>, vector<1x16x133xf32>
    %4 = vector.shape_cast %3 : vector<1x16x133xf32> to vector<16x133xf32>
    %5 = vector.shape_cast %2 : vector<16x133xf32> to vector<1x16x133xf32>
    tpu.vector_store %arg3[%c0_2, %c0_3, %c0_4], %5 {strides = array<i32>} : memref<1x16x133xf32, #tpu.memory_space<vmem>>, vector<1x16x133xf32>,
    return
  }
  func.func @transform_0(%arg0: i32, %arg1: i32) -> (i32, i32, i32) {
    %c0_i32 = arith.constant 0 : i32
    %c0_i32_0 = arith.constant 0 : i32
    return %arg0, %c0_i32, %arg1 : i32, i32, i32
  }
  func.func @transform_1(%arg0: i32, %arg1: i32) -> (i32, i32, i32) {
    %c0_i32 = arith.constant 0 : i32
    %c0_i32_0 = arith.constant 0 : i32
    return %arg0, %arg1, %c0_i32 : i32, i32, i32
  }
}

</mosaic_0001>

<bundles_post_ra>
// kernel: tpu_custom_call.1
= control target key start
LH: loop header
LB: loop body
LE: loop exit
PB: predicated region body
PF: predicated region fallthrough
CT: control target
= control target key end

     0   :  { %6 = vsyncpa [#allocation3], 0  ;;  %s622_s0 = inlined_call_operand.vmem [shape: f32[2,133,16], index: 0, kind: input, shape index: {}]   ;;  %s623_s1 = inlined_call_operand.hbm [shape: f32[2,16,133], index: 1, kind: output, shape index: {}]  }
   0x1   :  { %8 = vsyncpa [#allocation3 + $0x1], 0  ;;  %s488_s6 = smov 0   ;;  %s490_s7 = smov 0  }
   0x2   :  { %s492_s8 = smov 0   ;;  %s494_s9 = smov 0  }
   0x3   :  { %s496_s10 = smov 0   ;;  %s498_s11 = smov 0  }
   0x4 LB: > { %s323_s12 = sadd.s32 4294967295, %s473_s11   ;;  %s324_s13 = sadd.s32 4294967294, %s473_s11   ;;  %s473_s11 = sphi %s498_s11, %s14_s11   ;;  %s469_s10 = sphi %s496_s10, %s630_s10   ;;  %s465_s9 = sphi %s494_s9, %s629_s9   ;;  %s461_s8 = sphi %s492_s8, %s628_s8   ;;  %s457_s7 = sphi %s490_s7, %s627_s7   ;;  %s453_s6 = sphi %s488_s6, %s626_s6  }
   0x5   : > { %s26_s14 = sadd.s32 1, %s469_s10  ;;  %s63_s15 = sadd.s32 1, %s461_s8 }
   0x6   : > { %p28_p0 = scmp.ge.s32.totalorder %s26_s14, 2  ;;  %p73_p1 = scmp.ne.s32.totalorder %s461_s8, %s457_s7 }
   0x7   : > { %p74_p2 = scmp.eq.s32.totalorder %s323_s12, 1  ;;  %p79_p3 = scmp.ne.s32.totalorder %s457_s7, %s453_s6 }
   0x8   : > { %s632_s14 = smov (%p28_p0, %s26_s14), 0  ;;  %p80_p5 = scmp.eq.s32.totalorder %s324_s13, 1 }
   0x9   : > { %p528_p4 = por %p74_p2, %p73_p1  ;;  %s58_s17 = ssub.s32 %s469_s10, %s632_s14 }
   0xa   : > { %p327_p6 = scmp.ge.s32.totalorder %s473_s11, 1  ;;  %p61_p7 = scmp.eq.s32.totalorder %s58_s17, 0 }
   0xb   : > { %p535_p8 = por %p80_p5, %p79_p3  ;;  %p109_p9 = scmp.lt.s32.totalorder %s473_s11, 3 }
   0xc   : > { %s541_s19 = scalar_select %p61_p7, %s461_s8, %s63_s15  }
   0xd   : > { %p110_p10 = pnand %p327_p6, %p109_p9 }
   0xe   : > { %p132_p11 = scmp.lt.s32.totalorder (!%p110_p10), %s465_s9, 1  ;;  %s129_s25 = sand.u32 (!%p110_p10), 1, %s457_s7   ;;  %vm223_vm0 = vcmask (!%p110_p10), 39936  }
   0xf   : > { %113 = sbr.rel (%p110_p10) target bundleno = 177 (0xb1), region = 24  ;;  %s328_s26 = sshll.u32 (!%p110_p10), %s129_s25, 5 }
  0x10   : > { %s131_s27 = scalar_lea.vmem (!%p110_p10), [#allocation2], %s328_s26  ;;  %s335_s29 = sshll.u32 (!%p110_p10), %s465_s9, 9 }
  0x11   : > { %s244_s28 = sshll.u32 (!%p110_p10), %s131_s27, 4  ;;  %s574_s3 = scalar_lea.hbm (!%p110_p10), %s623_s1, %s335_s29  ;;  %s569_s28 = int_to_ptr.vmem [resolvable:$true] %s244_s28 }
  0x12   : > { %s576_s4 = scalar_lea.sflag (!%p110_p10), [#allocation3], %s129_s25  ;;  %s395_s5 = scalar_lea.vmem (!%p110_p10), %s569_s28, 512 }
  0x13   : > { %p396_p12 = scmp.ne.s32.totalorder (!%p110_p10), %s569_s28, %s395_s5 }
  0x15   : > { %p397_p13 = pnand (!%p110_p10), %p396_p12, %p528_p4 }
  0x16   : > { %s133_s20 = scalar_select %p132_p11, %s465_s9, 1 }
  0x17   : > { %p398_p0 = pneg %p397_p13  ;;  %s475_s9 = smov [#allocation2]  }
  0x18   : > { %s336_s21 = smul.u32 136, %s133_s20  ;;  %s399_s12 = sshll.u32 %s475_s9, 4  ;;  %s400_s12 = int_to_ptr.vmem [resolvable:$false] %s399_s12 }
  0x19   : > { %s401_s13 = scalar_lea.vmem %s400_s12, 1024  ;;  %p402_p1 = scmp.lt.s32.totalorder %s569_s28, %s400_s12 }
  0x1a   : > { %s548_s24 = scalar_lea.vmem %s622_s0, %s336_s21  ;;  %p403_p2 = scmp.lt.s32.totalorder %s401_s13, %s395_s5 }
  0x1b   : > { %v157_v0 = vld [vmem:[%s548_s24 + $0x80] sm:$0x1f]  ;;  %v142_v2 = vld [vmem:[%s548_s24 + $0x8] sm:$0xff]  ;;  %v143_v3 = vld [vmem:[%s548_s24 + $0x10] sm:$0xff] }
  0x1c   : > { %v141_v1 = vld [vmem:[%s548_s24] sm:$0xff]  ;;  %190 = vxpose.xlu1.b32.start.end [1/1] (short) (narrow) %v157_v0, 16  ;;  %v144_v4 = vld [vmem:[%s548_s24 + $0x18] sm:$0xff]  ;;  %v146_v6 = vld [vmem:[%s548_s24 + $0x28] sm:$0xff]  ;;  %p404_p3 = por %p403_p2, %p402_p1 }
  0x1d   : > { %158 = vxpose.xlu0.b32.start [1/16] (narrow) %v141_v1, 16  ;;  %v145_v5 = vld [vmem:[%s548_s24 + $0x20] sm:$0xff]  ;;  %v147_v7 = vld [vmem:[%s548_s24 + $0x30] sm:$0xff]  ;;  %v148_v8 = vld [vmem:[%s548_s24 + $0x38] sm:$0xff] }
  0x1e   : > { %v149_v9 = vld [vmem:[%s548_s24 + $0x40] sm:$0xff]  ;;  %v150_v10 = vld [vmem:[%s548_s24 + $0x48] sm:$0xff]  ;;  %v151_v11 = vld [vmem:[%s548_s24 + $0x50] sm:$0xff]  ;;  %p405_p5 = pnand %p404_p3, %p398_p0 }
  0x1f   : > { %v152_v12 = vld [vmem:[%s548_s24 + $0x58] sm:$0xff]  ;;  %v153_v13 = vld [vmem:[%s548_s24 + $0x60] sm:$0xff]  ;;  %v154_v14 = vld [vmem:[%s548_s24 + $0x68] sm:$0xff] }
  0x20   : > { %v155_v15 = vld [vmem:[%s548_s24 + $0x70] sm:$0xff]  ;;  %v156_v16 = vld [vmem:[%s548_s24 + $0x78] sm:$0xff] }
  0x21   : > { %159 = vxpose.xlu0.b32.cont [2/16] (narrow) %v142_v2, 16 }
  0x25   : > { %160 = vxpose.xlu0.b32.cont [3/16] (narrow) %v143_v3, 16 }
  0x29   : > { %161 = vxpose.xlu0.b32.cont [4/16] (narrow) %v144_v4, 16 }
  0x2d   : > { %162 = vxpose.xlu0.b32.cont [5/16] (narrow) %v145_v5, 16 }
  0x31   : > { %163 = vxpose.xlu0.b32.cont [6/16] (narrow) %v146_v6, 16 }
  0x35   : > { %164 = vxpose.xlu0.b32.cont [7/16] (narrow) %v147_v7, 16 }
  0x39   : > { %165 = vxpose.xlu0.b32.cont [8/16] (narrow) %v148_v8, 16 }
  0x3d   : > { %166 = vxpose.xlu0.b32.cont [9/16] (narrow) %v149_v9, 16 }
  0x41   : > { %167 = vxpose.xlu0.b32.cont [10/16] (narrow) %v150_v10, 16 }
  0x45   : > { %168 = vxpose.xlu0.b32.cont [11/16] (narrow) %v151_v11, 16 }
  0x49   : > { %169 = vxpose.xlu0.b32.cont [12/16] (narrow) %v152_v12, 16 }
  0x4d   : > { %170 = vxpose.xlu0.b32.cont [13/16] (narrow) %v153_v13, 16 }
  0x51   : > { %171 = vxpose.xlu0.b32.cont [14/16] (narrow) %v154_v14, 16 }
  0x55   : > { %172 = vxpose.xlu0.b32.cont [15/16] (narrow) %v155_v15, 16 }
  0x59   : > { %173 = vxpose.xlu0.b32.end [16/16] (narrow) %v156_v16, 16 }
  0x9c   : > { %v206_v17 = vpop.trf.xlu1 }
  0x9d   : > { %v174_v18 = vpop.trf.xlu0  ;;  %224 = vst.msk [vmem:[%s131_s27 + $0x8] sm:$0xff] %vm223_vm0, %v206_v17 }
  0x9e   : > { %222 = vst [vmem:[%s131_s27] sm:$0xff] %v174_v18 }
  0xa0   : > { %v207_v19 = vpop.trf.xlu1 }
  0xa1   : > { %v175_v20 = vpop.trf.xlu0  ;;  %226 = vst.msk [vmem:[%s131_s27 + $0x18] sm:$0xff] %vm223_vm0, %v207_v19 }
  0xa2   : > { %225 = vst [vmem:[%s131_s27 + $0x10] sm:$0xff] %v175_v20 }
  0xa3   : > { %408 = shalt.err (!%p405_p5)
}
  0xa4   : > { %s409_s15 = scalar_lea.hbm %s574_s3, 512  ;;  %s413_s21 = scalar_lea.hbm %s623_s1, 1024 }
  0xa5   : > { %p410_p6 = scmp.ne.s32.totalorder %s574_s3, %s409_s15  ;;  %p414_p10 = scmp.lt.u32.totalorder %s574_s3, %s623_s1 }
  0xa6   : > { %p415_p11 = scmp.lt.u32.totalorder %s413_s21, %s409_s15  ;;  %p417_p13 = scmp.lt.u32.totalorder %s409_s15, %s574_s3 }
  0xa7   : > { %p411_p7 = pnand %p410_p6, %p528_p4 }
  0xa8   : > { %p416_p12 = por %p415_p11, %p414_p10 }
  0xa9   : > { %p412_p9 = pneg %p411_p7 }
  0xaa   : > { %p418_p0 = por %p417_p13, %p416_p12 }
  0xac   : > { %p419_p1 = pnand %p418_p0, %p412_p9 }
  0xae   : > { %422 = shalt.err (!%p419_p1)
}
  0xaf   : > { %s476_s24 = smov 256   ;;  %s477_s25 = smov 16  }
  0xb0   : > { %337 = dma.vmem_to_hbm [thread:$0]  (%p528_p4), %s569_s28, 512, %s574_s3, %s576_s4, %s476_s24, %s476_s24, %s477_s25  }
  0xb1 PF: > { %p343_p2 = scmp.ge.s32.totalorder %s473_s11, 2  ;;  %s259_s26 = sand.u32 1, %s453_s6  }
  0xb2   : > { %s260_s27 = scalar_lea.sflag [#allocation3], %s259_s26 }
  0xb3   : > { %p340_p3 = pnand %p343_p2, %p535_p8 }
  0xb5   : > { %448 = dma.done.wait (!%p340_p3), %s260_s27, 512  }
  0xb6   : > { %450 = vsyncadd (!%p340_p3), %s260_s27, 4294966784  ;;  %s14_s11 = sadd.s32 1, %s473_s11   ;;  %s626_s6 = smov %s457_s7 }
  0xb7   : > { %p11_p5 = scmp.ge.s32.totalorder %s14_s11, 4   ;;  %s627_s7 = smov %s461_s8 }
  0xb8   : > { %s628_s8 = smov %s541_s19  ;;  %s629_s9 = smov %s469_s10 }
  0xb9   : > { %s630_s10 = smov %s632_s14  ;;  %13 = sbr.rel (!%p11_p5) target bundleno = 4 (0x4), region = 59 }
  0xc0   :  { %265 = vsyncpa [#allocation3], 1 }
  0xc1   :  { %267 = vsyncpa [#allocation3 + $0x1], 1 }

</bundles_post_ra>
